<compile_context>
chip_gen: v7x
topology: tpu7x:2x2x1
jax: 0.10.0
libtpu: 0.0.40
codegen_flags: <defaults>
</compile_context>

<pallas_src>
import jax
import jax.numpy as jnp
from jax.experimental import pallas as pl
from jax.experimental.pallas import tpu as pltpu

HIDDEN = 128  # nn.Linear(input_dim, 128) / nn.Linear(128, input_dim)


def _round_up(n, m):
    return ((n + m - 1) // m) * m


# ----------------------------------------------------------------------------- kernel body
def _make_kernel(emit_latent):
    def kernel(x_ref,
               w1_ref, b1_ref, w2_ref, b2_ref,
               w3_ref, b3_ref, w4_ref, b4_ref,
               *out_refs):
        # x arrives as f32 from HBM; cast to bf16 in-register for the MXU (no wrapper pass).
        x = x_ref[...].astype(jnp.bfloat16)

        # encoder: Linear(input_dim, 128) -> ReLU -> Linear(128, latent_dim) -> ReLU
        h1 = jnp.dot(x, w1_ref[...], preferred_element_type=jnp.float32) + b1_ref[...]
        h1 = jnp.maximum(h1, 0.0)
        lat = jnp.dot(h1.astype(jnp.bfloat16), w2_ref[...],
                      preferred_element_type=jnp.float32) + b2_ref[...]
        lat = jnp.maximum(lat, 0.0)

        # decoder: Linear(latent_dim, 128) -> ReLU -> Linear(128, input_dim) -> Sigmoid
        h2 = jnp.dot(lat.astype(jnp.bfloat16), w3_ref[...],
                     preferred_element_type=jnp.float32) + b3_ref[...]
        h2 = jnp.maximum(h2, 0.0)
        logits = jnp.dot(h2.astype(jnp.bfloat16), w4_ref[...],
                         preferred_element_type=jnp.float32) + b4_ref[...]
        # Exact sigmoid: kernel is HBM-bound, so the divide is free; matches PyTorch closely.
        recon = 1.0 / (1.0 + jnp.exp(-logits))

        if emit_latent:
            latent_ref, recon_ref = out_refs
            latent_ref[...] = lat.astype(latent_ref.dtype)
        else:
            (recon_ref,) = out_refs
        recon_ref[...] = recon.astype(recon_ref.dtype)

    return kernel


# ----------------------------------------------------------------------------- param prep
def prepare_params(params):
    """One-time pad (to lane multiples of 128) + bf16 cast of weights.  Call ONCE, reuse."""
    input_dim, hidden = params["w1"].shape
    latent_dim = params["w2"].shape[1]
    in_pad = _round_up(input_dim, 128)
    lat_pad = _round_up(latent_dim, 128)

    def pad2(a, rows, cols):
        return jnp.pad(a, ((0, rows - a.shape[0]), (0, cols - a.shape[1])))

    prepped = dict(
        w1=pad2(params["w1"], in_pad, hidden).astype(jnp.bfloat16),
        b1=pad2(params["b1"], 1, hidden).astype(jnp.float32),
        w2=pad2(params["w2"], hidden, lat_pad).astype(jnp.bfloat16),
        b2=pad2(params["b2"], 1, lat_pad).astype(jnp.float32),
        w3=pad2(params["w3"], lat_pad, hidden).astype(jnp.bfloat16),
        b3=pad2(params["b3"], 1, hidden).astype(jnp.float32),
        w4=pad2(params["w4"], hidden, in_pad).astype(jnp.bfloat16),
        b4=pad2(params["b4"], 1, in_pad).astype(jnp.float32),
    )
    dims = dict(input_dim=input_dim, latent_dim=latent_dim, hidden=hidden,
                in_pad=in_pad, lat_pad=lat_pad)
    return prepped, dims


def _pick_tb(B, in_pad, lat_pad, hidden, tile_b, out_itemsize):
    """Batch-tile rows from a per-tile VMEM budget (fits under the 32 MiB scoped limit)."""
    vmem_budget = 24 * 1024 * 1024
    row_align = 16 if out_itemsize < 4 else 8         # bf16 tiles pack (16,128)
    per_row = (2 * 4 * in_pad                          # f32 x tile, double-buffered
               + 2 * out_itemsize * (in_pad + lat_pad)  # output tiles, double-buffered
               + 4 * (in_pad + lat_pad + 2 * hidden))   # f32 live intermediates
    weight_bytes = 2 * (2 * 2 * hidden * (in_pad + lat_pad)     # bf16 weights, dbl-buffered
                        + 4 * (2 * hidden + in_pad + lat_pad))  # f32 biases, dbl-buffered
    cap = max(row_align, (vmem_budget - weight_bytes) // per_row)
    tb = min(tile_b, cap)
    if B >= 1024:
        # Keep >=4 grid steps: shards the "parallel" batch axis across both v7x TensorCores
        # and gives the input/output pipeline something to overlap.
        tb = min(tb, _round_up(pl.cdiv(B, 4), row_align))
    tb = min(tb, _round_up(B, row_align))
    return max(row_align, (tb // row_align) * row_align)


# ----------------------------------------------------------------------------- wrapper
def simple_autoencoder(x, prepped, dims, *, tile_b=2048,
                       out_dtype=jnp.bfloat16, return_latent=True):
    """x: (B, input_dim) float32. prepped/dims from prepare_params(). Returns (latent, recon)."""
    B, input_dim = x.shape
    assert input_dim == dims["input_dim"]
    hidden, latent_dim = dims["hidden"], dims["latent_dim"]
    in_pad, lat_pad = dims["in_pad"], dims["lat_pad"]

    # Feature-axis zero padding is required whenever input_dim % 128 != 0 (otherwise
    # garbage columns would be contracted into valid outputs).  Skipped when aligned.
    if input_dim != in_pad:
        x = jnp.pad(x, ((0, 0), (0, in_pad - input_dim)))
    # NOTE: x stays f32; the kernel casts to bf16 in-register (no wrapper cast pass).

    out_itemsize = jnp.dtype(out_dtype).itemsize
    tb = _pick_tb(B, in_pad, lat_pad, hidden, tile_b, out_itemsize)
    grid = (pl.cdiv(B, tb),)   # ragged final block; no physical batch padding

    def act_spec(d):
        return pl.BlockSpec((tb, d), lambda i: (i, 0))

    def resident_spec(a):   # weights/biases: constant index map -> DMA'd once, stay in VMEM
        return pl.BlockSpec(a.shape, lambda i: (0, 0))

    out_shapes = []
    out_specs = []
    if return_latent:
        out_shapes.append(jax.ShapeDtypeStruct((B, lat_pad), out_dtype))
        out_specs.append(act_spec(lat_pad))
    out_shapes.append(jax.ShapeDtypeStruct((B, in_pad), out_dtype))
    out_specs.append(act_spec(in_pad))

    w1, b1 = prepped["w1"], prepped["b1"]
    w2, b2 = prepped["w2"], prepped["b2"]
    w3, b3 = prepped["w3"], prepped["b3"]
    w4, b4 = prepped["w4"], prepped["b4"]

    flops = 2 * B * (in_pad * hidden + hidden * lat_pad
                     + lat_pad * hidden + hidden * in_pad)
    weight_bytes = sum(int(a.size) * a.dtype.itemsize
                       for a in (w1, b1, w2, b2, w3, b3, w4, b4))
    out_rows_bytes = (in_pad + (lat_pad if return_latent else 0)) * out_itemsize
    bytes_accessed = B * in_pad * 4 + weight_bytes + B * out_rows_bytes

    results = pl.pallas_call(
        _make_kernel(return_latent),
        grid=grid,
        out_shape=tuple(out_shapes),
        in_specs=[act_spec(in_pad),
                  resident_spec(w1), resident_spec(b1),
                  resident_spec(w2), resident_spec(b2),
                  resident_spec(w3), resident_spec(b3),
                  resident_spec(w4), resident_spec(b4)],
        out_specs=tuple(out_specs),
        compiler_params=pltpu.CompilerParams(
            dimension_semantics=("parallel",),
            vmem_limit_bytes=32 * 1024 * 1024),
        cost_estimate=pl.CostEstimate(flops=flops,
                                      transcendentals=B * in_pad,
                                      bytes_accessed=bytes_accessed),
    )(x, w1, b1, w2, b2, w3, b3, w4, b4)

    if return_latent:
        latent_p, recon_p = results
    else:
        (recon_p,) = results

    # Slice lane padding only when it exists (no-op passes are skipped entirely).
    recon = recon_p[:, :input_dim] if in_pad != input_dim else recon_p
    if not return_latent:
        return recon
    latent = latent_p[:, :latent_dim] if lat_pad != latent_dim else latent_p
    return latent, recon


# ----------------------------------------------------------------------------- init / ref
def init_params(key, input_dim, latent_dim, hidden=HIDDEN):
    """Deterministic init mimicking PyTorch Linear (uniform +/- 1/sqrt(fan_in)); W is (in, out)."""
    def linear(k, fan_in, fan_out):
        kw, kb = jax.random.split(k)
        bound = 1.0 / jnp.sqrt(jnp.float32(fan_in))
        w = jax.random.uniform(kw, (fan_in, fan_out), jnp.float32, -bound, bound)
        b = jax.random.uniform(kb, (1, fan_out), jnp.float32, -bound, bound)
        return w, b

    k1, k2, k3, k4 = jax.random.split(key, 4)
    w1, b1 = linear(k1, input_dim, hidden)
    w2, b2 = linear(k2, hidden, latent_dim)
    w3, b3 = linear(k3, latent_dim, hidden)
    w4, b4 = linear(k4, hidden, input_dim)
    return dict(w1=w1, b1=b1, w2=w2, b2=b2, w3=w3, b3=b3, w4=w4, b4=b4)


def reference(x, p):
    """Pure-JAX reference mirroring the kernel's bf16-at-MXU / f32-elsewhere recipe."""
    def lin(a, w, b):
        return jnp.dot(a.astype(jnp.bfloat16), w.astype(jnp.bfloat16),
                       preferred_element_type=jnp.float32) + b
    h1 = jax.nn.relu(lin(x, p["w1"], p["b1"]))
    lat = jax.nn.relu(lin(h1, p["w2"], p["b2"]))
    h2 = jax.nn.relu(lin(lat, p["w3"], p["b3"]))
    rec = jax.nn.sigmoid(lin(h2, p["w4"], p["b4"]))
    return lat, rec


if __name__ == "__main__":
    key = jax.random.PRNGKey(0)
    k_params, k_x = jax.random.split(key)

    batch, input_dim, latent_dim = 16, 64, 32
    raw_params = init_params(k_params, input_dim, latent_dim)
    x = jax.random.uniform(k_x, (batch, input_dim), jnp.float32)

    prepped, dims = prepare_params(raw_params)          # one-time pad + bf16 cast
    latent, recon = simple_autoencoder(x, prepped, dims)
    jax.block_until_ready((latent, recon))

    lat_ref, rec_ref = reference(x, raw_params)
    assert latent.shape == (batch, latent_dim)
    assert recon.shape == (batch, input_dim)
    assert jnp.allclose(latent.astype(jnp.float32), lat_ref, atol=2e-2, rtol=2e-2)
    assert jnp.allclose(recon.astype(jnp.float32), rec_ref, atol=2e-2, rtol=2e-2)

    print("KERNEL_OK")
</pallas_src>

<mosaic_0001>
module attributes {stable_mosaic.version = 11 : i64} {
  func.func @kernel(%arg0: i32, %arg1: memref<16x128xf32, #tpu.memory_space<vmem>>, %arg2: memref<128x128xbf16, #tpu.memory_space<vmem>>, %arg3: memref<1x128xf32, #tpu.memory_space<vmem>>, %arg4: memref<128x128xbf16, #tpu.memory_space<vmem>>, %arg5: memref<1x128xf32, #tpu.memory_space<vmem>>, %arg6: memref<128x128xbf16, #tpu.memory_space<vmem>>, %arg7: memref<1x128xf32, #tpu.memory_space<vmem>>, %arg8: memref<128x128xbf16, #tpu.memory_space<vmem>>, %arg9: memref<1x128xf32, #tpu.memory_space<vmem>>, %arg10: memref<16x128xbf16, #tpu.memory_space<vmem>>, %arg11: memref<16x128xbf16, #tpu.memory_space<vmem>>) attributes {dimension_semantics = [#tpu.dimension_semantics<parallel>], iteration_bounds = array<i64: 1>, scalar_prefetch = 0 : i64, scratch_operands = 0 : i64, tpu.core_type = #tpu.core_type<tc>, window_params = [{transform_indices = @transform_0, window_bounds = array<i64: 16, 128>}, {pipeline_mode = #tpu.pipeline_mode<synchronous>, transform_indices = @transform_1, window_bounds = array<i64: 128, 128>}, {pipeline_mode = #tpu.pipeline_mode<synchronous>, transform_indices = @transform_2, window_bounds = array<i64: 1, 128>}, {pipeline_mode = #tpu.pipeline_mode<synchronous>, transform_indices = @transform_3, window_bounds = array<i64: 128, 128>}, {pipeline_mode = #tpu.pipeline_mode<synchronous>, transform_indices = @transform_4, window_bounds = array<i64: 1, 128>}, {pipeline_mode = #tpu.pipeline_mode<synchronous>, transform_indices = @transform_5, window_bounds = array<i64: 128, 128>}, {pipeline_mode = #tpu.pipeline_mode<synchronous>, transform_indices = @transform_6, window_bounds = array<i64: 1, 128>}, {pipeline_mode = #tpu.pipeline_mode<synchronous>, transform_indices = @transform_7, window_bounds = array<i64: 128, 128>}, {pipeline_mode = #tpu.pipeline_mode<synchronous>, transform_indices = @transform_8, window_bounds = array<i64: 1, 128>}, {transform_indices = @transform_9, window_bounds = array<i64: 16, 128>}, {transform_indices = @transform_10, window_bounds = array<i64: 16, 128>}]} {
    %c0 = arith.constant 0 : index
    %c0_0 = arith.constant 0 : index
    %0 = vector.load %arg1[%c0, %c0_0] : memref<16x128xf32, #tpu.memory_space<vmem>>, vector<16x128xf32>
    %1 = arith.truncf %0 : vector<16x128xf32> to vector<16x128xbf16>
    %c0_1 = arith.constant 0 : index
    %c0_2 = arith.constant 0 : index
    %2 = vector.load %arg2[%c0_1, %c0_2] : memref<128x128xbf16, #tpu.memory_space<vmem>>, vector<128x128xbf16>
    %cst = arith.constant dense<0.000000e+00> : vector<16x128xf32>
    %3 = tpu.matmul %1, %2, %cst {dimension_numbers = #tpu.dot_dimension_numbers<[1], [0], [0], [1], [0, 0, 1, 1], [], []>} : vector<16x128xbf16>, vector<128x128xbf16>, vector<16x128xf32> -> vector<16x128xf32>
    %c0_3 = arith.constant 0 : index
    %c0_4 = arith.constant 0 : index
    %4 = vector.load %arg3[%c0_3, %c0_4] : memref<1x128xf32, #tpu.memory_space<vmem>>, vector<1x128xf32>
    %5 = vector.broadcast %4 : vector<1x128xf32> to vector<16x128xf32>
    %6 = arith.addf %3, %5 : vector<16x128xf32>
    %cst_5 = arith.constant 0.000000e+00 : f32
    %7 = vector.broadcast %cst_5 : f32 to vector<16x128xf32>
    %8 = arith.maximumf %6, %7 : vector<16x128xf32>
    %9 = arith.truncf %8 : vector<16x128xf32> to vector<16x128xbf16>
    %c0_6 = arith.constant 0 : index
    %c0_7 = arith.constant 0 : index
    %10 = vector.load %arg4[%c0_6, %c0_7] : memref<128x128xbf16, #tpu.memory_space<vmem>>, vector<128x128xbf16>
    %cst_8 = arith.constant dense<0.000000e+00> : vector<16x128xf32>
    %11 = tpu.matmul %9, %10, %cst_8 {dimension_numbers = #tpu.dot_dimension_numbers<[1], [0], [0], [1], [0, 0, 1, 1], [], []>} : vector<16x128xbf16>, vector<128x128xbf16>, vector<16x128xf32> -> vector<16x128xf32>
    %c0_9 = arith.constant 0 : index
    %c0_10 = arith.constant 0 : index
    %12 = vector.load %arg5[%c0_9, %c0_10] : memref<1x128xf32, #tpu.memory_space<vmem>>, vector<1x128xf32>
    %13 = vector.broadcast %12 : vector<1x128xf32> to vector<16x128xf32>
    %14 = arith.addf %11, %13 : vector<16x128xf32>
    %cst_11 = arith.constant 0.000000e+00 : f32
    %15 = vector.broadcast %cst_11 : f32 to vector<16x128xf32>
    %16 = arith.maximumf %14, %15 : vector<16x128xf32>
    %17 = arith.truncf %16 : vector<16x128xf32> to vector<16x128xbf16>
    %c0_12 = arith.constant 0 : index
    %c0_13 = arith.constant 0 : index
    %18 = vector.load %arg6[%c0_12, %c0_13] : memref<128x128xbf16, #tpu.memory_space<vmem>>, vector<128x128xbf16>
    %cst_14 = arith.constant dense<0.000000e+00> : vector<16x128xf32>
    %19 = tpu.matmul %17, %18, %cst_14 {dimension_numbers = #tpu.dot_dimension_numbers<[1], [0], [0], [1], [0, 0, 1, 1], [], []>} : vector<16x128xbf16>, vector<128x128xbf16>, vector<16x128xf32> -> vector<16x128xf32>
    %c0_15 = arith.constant 0 : index
    %c0_16 = arith.constant 0 : index
    %20 = vector.load %arg7[%c0_15, %c0_16] : memref<1x128xf32, #tpu.memory_space<vmem>>, vector<1x128xf32>
    %21 = vector.broadcast %20 : vector<1x128xf32> to vector<16x128xf32>
    %22 = arith.addf %19, %21 : vector<16x128xf32>
    %cst_17 = arith.constant 0.000000e+00 : f32
    %23 = vector.broadcast %cst_17 : f32 to vector<16x128xf32>
    %24 = arith.maximumf %22, %23 : vector<16x128xf32>
    %25 = arith.truncf %24 : vector<16x128xf32> to vector<16x128xbf16>
    %c0_18 = arith.constant 0 : index
    %c0_19 = arith.constant 0 : index
    %26 = vector.load %arg8[%c0_18, %c0_19] : memref<128x128xbf16, #tpu.memory_space<vmem>>, vector<128x128xbf16>
    %cst_20 = arith.constant dense<0.000000e+00> : vector<16x128xf32>
    %27 = tpu.matmul %25, %26, %cst_20 {dimension_numbers = #tpu.dot_dimension_numbers<[1], [0], [0], [1], [0, 0, 1, 1], [], []>} : vector<16x128xbf16>, vector<128x128xbf16>, vector<16x128xf32> -> vector<16x128xf32>
    %c0_21 = arith.constant 0 : index
    %c0_22 = arith.constant 0 : index
    %28 = vector.load %arg9[%c0_21, %c0_22] : memref<1x128xf32, #tpu.memory_space<vmem>>, vector<1x128xf32>
    %29 = vector.broadcast %28 : vector<1x128xf32> to vector<16x128xf32>
    %30 = arith.addf %27, %29 : vector<16x128xf32>
    %cst_23 = arith.constant 0.000000e+00 : f32
    %31 = vector.broadcast %cst_23 : f32 to vector<16x128xf32>
    %32 = arith.subf %31, %30 : vector<16x128xf32>
    %33 = math.exp %32 : vector<16x128xf32>
    %cst_24 = arith.constant 1.000000e+00 : f32
    %34 = vector.broadcast %cst_24 : f32 to vector<16x128xf32>
    %35 = arith.addf %34, %33 : vector<16x128xf32>
    %cst_25 = arith.constant 1.000000e+00 : f32
    %36 = vector.broadcast %cst_25 : f32 to vector<16x128xf32>
    %37 = arith.divf %36, %35 : vector<16x128xf32>
    %38 = arith.truncf %16 : vector<16x128xf32> to vector<16x128xbf16>
    %c0_26 = arith.constant 0 : index
    %c0_27 = arith.constant 0 : index
    %39 = vector.load %arg10[%c0_26, %c0_27] : memref<16x128xbf16, #tpu.memory_space<vmem>>, vector<16x128xbf16>
    tpu.vector_store %arg10[%c0_26, %c0_27], %38 {strides = array<i32>} : memref<16x128xbf16, #tpu.memory_space<vmem>>, vector<16x128xbf16>,
    %40 = arith.truncf %37 : vector<16x128xf32> to vector<16x128xbf16>
    %c0_28 = arith.constant 0 : index
    %c0_29 = arith.constant 0 : index
    %41 = vector.load %arg11[%c0_28, %c0_29] : memref<16x128xbf16, #tpu.memory_space<vmem>>, vector<16x128xbf16>
    tpu.vector_store %arg11[%c0_28, %c0_29], %40 {strides = array<i32>} : memref<16x128xbf16, #tpu.memory_space<vmem>>, vector<16x128xbf16>,
    return
  }
  func.func @transform_0(%arg0: i32) -> (i32, i32) {
    %c0_i32 = arith.constant 0 : i32
    %c0_i32_0 = arith.constant 0 : i32
    return %arg0, %c0_i32 : i32, i32
  }
  func.func @transform_1(%arg0: i32) -> (i32, i32) {
    %c0_i32 = arith.constant 0 : i32
    %c0_i32_0 = arith.constant 0 : i32
    %c0_i32_1 = arith.constant 0 : i32
    return %c0_i32, %c0_i32_0 : i32, i32
  }
  func.func @transform_2(%arg0: i32) -> (i32, i32) {
    %c0_i32 = arith.constant 0 : i32
    %c0_i32_0 = arith.constant 0 : i32
    %c0_i32_1 = arith.constant 0 : i32
    return %c0_i32, %c0_i32_0 : i32, i32
  }
  func.func @transform_3(%arg0: i32) -> (i32, i32) {
    %c0_i32 = arith.constant 0 : i32
    %c0_i32_0 = arith.constant 0 : i32
    %c0_i32_1 = arith.constant 0 : i32
    return %c0_i32, %c0_i32_0 : i32, i32
  }
  func.func @transform_4(%arg0: i32) -> (i32, i32) {
    %c0_i32 = arith.constant 0 : i32
    %c0_i32_0 = arith.constant 0 : i32
    %c0_i32_1 = arith.constant 0 : i32
    return %c0_i32, %c0_i32_0 : i32, i32
  }
  func.func @transform_5(%arg0: i32) -> (i32, i32) {
    %c0_i32 = arith.constant 0 : i32
    %c0_i32_0 = arith.constant 0 : i32
    %c0_i32_1 = arith.constant 0 : i32
    return %c0_i32, %c0_i32_0 : i32, i32
  }
  func.func @transform_6(%arg0: i32) -> (i32, i32) {
    %c0_i32 = arith.constant 0 : i32
    %c0_i32_0 = arith.constant 0 : i32
    %c0_i32_1 = arith.constant 0 : i32
    return %c0_i32, %c0_i32_0 : i32, i32
  }
  func.func @transform_7(%arg0: i32) -> (i32, i32) {
    %c0_i32 = arith.constant 0 : i32
    %c0_i32_0 = arith.constant 0 : i32
    %c0_i32_1 = arith.constant 0 : i32
    return %c0_i32, %c0_i32_0 : i32, i32
  }
  func.func @transform_8(%arg0: i32) -> (i32, i32) {
    %c0_i32 = arith.constant 0 : i32
    %c0_i32_0 = arith.constant 0 : i32
    %c0_i32_1 = arith.constant 0 : i32
    return %c0_i32, %c0_i32_0 : i32, i32
  }
  func.func @transform_9(%arg0: i32) -> (i32, i32) {
    %c0_i32 = arith.constant 0 : i32
    %c0_i32_0 = arith.constant 0 : i32
    return %arg0, %c0_i32 : i32, i32
  }
  func.func @transform_10(%arg0: i32) -> (i32, i32) {
    %c0_i32 = arith.constant 0 : i32
    %c0_i32_0 = arith.constant 0 : i32
    return %arg0, %c0_i32 : i32, i32
  }
}

</mosaic_0001>

<bundles_post_ra>
// kernel: tpu_custom_call.1
= control target key start
LH: loop header
LB: loop body
LE: loop exit
PB: predicated region body
PF: predicated region fallthrough
CT: control target
= control target key end

     0   :  { %16 = vsyncpa [#allocation3], 0  ;;  %s1240_s0 = inlined_call_operand.hbm [shape: f32[16,128], index: 0, kind: input, shape index: {}]   ;;  %s1241_s1 = inlined_call_operand.hbm [shape: bf16[128,128], index: 1, kind: input, shape index: {}]   ;;  %s1242_s2 = inlined_call_operand.vmem [shape: f32[1,128], index: 2, kind: input, shape index: {}]   ;;  %s1243_s3 = inlined_call_operand.hbm [shape: bf16[128,128], index: 3, kind: input, shape index: {}]   ;;  %s1244_s4 = inlined_call_operand.vmem [shape: f32[1,128], index: 4, kind: input, shape index: {}]   ;;  %s1245_s5 = inlined_call_operand.hbm [shape: bf16[128,128], index: 5, kind: input, shape index: {}]   ;;  %s1246_s6 = inlined_call_operand.vmem [shape: f32[1,128], index: 6, kind: input, shape index: {}]   ;;  %s1247_s7 = inlined_call_operand.hbm [shape: bf16[128,128], index: 7, kind: input, shape index: {}]   ;;  %s1248_s8 = inlined_call_operand.vmem [shape: f32[1,128], index: 8, kind: input, shape index: {}]   ;;  %s1249_s9 = inlined_call_operand.hbm [shape: bf16[16,128], index: 9, kind: output, shape index: {0}]   ;;  %s1250_s10 = inlined_call_operand.hbm [shape: bf16[16,128], index: 10, kind: output, shape index: {1}]  }
   0x1   :  { %17 = vsyncpa [#allocation6], 0 }
   0x2   :  { %18 = vsyncpa [#allocation9], 0 }
   0x3   :  { %19 = vsyncpa [#allocation4], 0 }
   0x4   :  { %20 = vsyncpa [#allocation13], 0  ;;  %s1018_s13 = smov [#allocation5]   ;;  %s854_s17 = scalar_lea.hbm %s1241_s1, 1024 }
   0x5   :  { %s38_s14 = sshll.u32 %s1018_s13, 4  ;;  %p855_p0 = scmp.ne.s32.totalorder %s1241_s1, %s854_s17  ;;  %s39_s14 = int_to_ptr.vmem [resolvable:$true] %s38_s14 }
   0x6   :  { %p858_p1 = scmp.lt.u32.totalorder %s854_s17, %s1241_s1 }
   0x8   :  { %p860_p2 = pnand %p858_p1, %p855_p0 }
   0xa   :  { %863 = shalt.err (!%p860_p2)
}
   0xb   :  { %s864_s22 = scalar_lea.vmem %s39_s14, 1024  ;;  %p869_p4 = scmp.lt.s32.totalorder %s39_s14, %s39_s14 }
   0xc   :  { %p865_p3 = scmp.ne.s32.totalorder %s39_s14, %s864_s22  ;;  %p870_p5 = scmp.lt.s32.totalorder %s864_s22, %s864_s22 }
   0xe   :  { %p871_p6 = por %p870_p5, %p869_p4 }
  0x10   :  { %p872_p7 = pnand %p871_p6, %p865_p3 }
  0x12   :  { %875 = shalt.err (!%p872_p7)
}
  0x13   :  { %s1019_s23 = smov 64   ;;  %s1020_s24 = smov 4  }
  0x14   :  { %44 = dma.hbm_to_vmem [thread:$0]  %s1241_s1, 1024, %s39_s14, [#allocation6], %s1019_s23, %s1019_s23, %s1020_s24  }
  0x15   :  { %s1021_s27 = smov [#allocation8]   ;;  %s1022_s29 = smov [#allocation2]  }
  0x16   :  { %s66_s28 = sshll.u32 %s1021_s27, 4  ;;  %s26_s30 = sshll.u32 %s1022_s29, 4  ;;  %s67_s28 = int_to_ptr.vmem [resolvable:$true] %s66_s28  ;;  %s27_s30 = int_to_ptr.vmem [resolvable:$true] %s26_s30 }
  0x17   :  { %s876_s13 = scalar_lea.hbm %s1245_s5, 1024 }
  0x18   :  { %p877_p8 = scmp.ne.s32.totalorder %s1245_s5, %s876_s13  ;;  %p880_p9 = scmp.lt.u32.totalorder %s876_s13, %s1245_s5 }
  0x1a   :  { %p882_p10 = pnand %p880_p9, %p877_p8 }
  0x1c   :  { %885 = shalt.err (!%p882_p10)
}
  0x1d   :  { %s886_s1 = scalar_lea.vmem %s67_s28, 1024  ;;  %p891_p12 = scmp.lt.s32.totalorder %s67_s28, %s67_s28 }
  0x1e   :  { %p887_p11 = scmp.ne.s32.totalorder %s67_s28, %s886_s1  ;;  %p892_p13 = scmp.lt.s32.totalorder %s886_s1, %s886_s1 }
  0x20   :  { %p893_p0 = por %p892_p13, %p891_p12 }
  0x22   :  { %p894_p1 = pnand %p893_p0, %p887_p11 }
  0x24   :  { %897 = shalt.err (!%p894_p1)
}
  0x25   :  { %72 = dma.hbm_to_vmem [thread:$0]  %s1245_s5, 1024, %s67_s28, [#allocation9], %s1019_s23, %s1019_s23, %s1020_s24  }
  0x26   :  { %s898_s22 = scalar_lea.hbm %s1240_s0, 256 }
  0x27   :  { %p899_p2 = scmp.ne.s32.totalorder %s1240_s0, %s898_s22  ;;  %p902_p3 = scmp.lt.u32.totalorder %s898_s22, %s1240_s0 }
  0x29   :  { %p904_p4 = pnand %p902_p3, %p899_p2 }
  0x2b   :  { %907 = shalt.err (!%p904_p4)
}
  0x2c   :  { %s908_s11 = scalar_lea.vmem %s27_s30, 256  ;;  %p913_p6 = scmp.lt.s32.totalorder %s27_s30, %s27_s30 }
  0x2d   :  { %p909_p5 = scmp.ne.s32.totalorder %s27_s30, %s908_s11  ;;  %p914_p7 = scmp.lt.s32.totalorder %s908_s11, %s908_s11 }
  0x2f   :  { %p915_p8 = por %p914_p7, %p913_p6 }
  0x31   :  { %p916_p9 = pnand %p915_p8, %p909_p5 }
  0x33   :  { %919 = shalt.err (!%p916_p9)
}
  0x34   :  { %s1023_s5 = smov 128   ;;  %s1024_s28 = smov 8  }
  0x35   :  { %32 = dma.hbm_to_vmem [thread:$0]  %s1240_s0, 256, %s27_s30, [#allocation3], %s1023_s5, %s1023_s5, %s1024_s28  }
  0x36   :  { %s1025_s15 = smov [#allocation7]   ;;  %s1026_s17 = smov [#allocation10]  }
  0x37   :  { %s52_s16 = sshll.u32 %s1025_s15, 4  ;;  %s80_s18 = sshll.u32 %s1026_s17, 4  ;;  %s53_s16 = int_to_ptr.vmem [resolvable:$true] %s52_s16  ;;  %s81_s18 = int_to_ptr.vmem [resolvable:$true] %s80_s18 }
  0x38   :  { %s920_s19 = scalar_lea.hbm %s1243_s3, 1024 }
  0x39   :  { %p921_p10 = scmp.ne.s32.totalorder %s1243_s3, %s920_s19  ;;  %p924_p11 = scmp.lt.u32.totalorder %s920_s19, %s1243_s3 }
  0x3b   :  { %p926_p12 = pnand %p924_p11, %p921_p10 }
  0x3d   :  { %929 = shalt.err (!%p926_p12)
}
  0x3e   :  { %s930_s0 = scalar_lea.vmem %s53_s16, 1024  ;;  %p935_p0 = scmp.lt.s32.totalorder %s53_s16, %s53_s16 }
  0x3f   :  { %p931_p13 = scmp.ne.s32.totalorder %s53_s16, %s930_s0  ;;  %p936_p1 = scmp.lt.s32.totalorder %s930_s0, %s930_s0 }
  0x41   :  { %p937_p2 = por %p936_p1, %p935_p0 }
  0x43   :  { %p938_p3 = pnand %p937_p2, %p931_p13 }
  0x45   :  { %941 = shalt.err (!%p938_p3)
}
  0x46   :  { %58 = dma.hbm_to_vmem [thread:$0]  %s1243_s3, 1024, %s53_s16, [#allocation6], %s1019_s23, %s1019_s23, %s1020_s24  }
  0x47   :  { %s942_s11 = scalar_lea.hbm %s1247_s7, 1024 }
  0x48   :  { %p943_p4 = scmp.ne.s32.totalorder %s1247_s7, %s942_s11  ;;  %p946_p5 = scmp.lt.u32.totalorder %s942_s11, %s1247_s7 }
  0x4a   :  { %p948_p6 = pnand %p946_p5, %p943_p4 }
  0x4c   :  { %951 = shalt.err (!%p948_p6)
}
  0x4d   :  { %s952_s15 = scalar_lea.vmem %s81_s18, 1024  ;;  %p957_p8 = scmp.lt.s32.totalorder %s81_s18, %s81_s18 }
  0x4e   :  { %p953_p7 = scmp.ne.s32.totalorder %s81_s18, %s952_s15  ;;  %p958_p9 = scmp.lt.s32.totalorder %s952_s15, %s952_s15 }
  0x50   :  { %p959_p10 = por %p958_p9, %p957_p8 }
  0x52   :  { %p960_p11 = pnand %p959_p10, %p953_p7 }
  0x54   :  { %963 = shalt.err (!%p960_p11)
}
  0x55   :  { %86 = dma.hbm_to_vmem [thread:$0]  %s1247_s7, 1024, %s81_s18, [#allocation9], %s1019_s23, %s1019_s23, %s1020_s24  }
  0x56   :  { %1008 = dma.done.wait [#allocation3], 256  }
  0x57   :  { %1009 = vsyncadd [#allocation3], 4294967040 }
  0x58   :  { %1010 = dma.done.wait [#allocation6], 2048  }
  0x59   :  { %1011 = vsyncadd [#allocation6], 4294965248 }
  0x5a   :  { %1012 = dma.done.wait [#allocation9], 2048  }
  0x5b   :  { %1013 = vsyncadd [#allocation9], 4294965248  ;;  %v1027_v0 = vmov 0.0   ;;  %vm1028_vm0 = vmmov 0   ;;  %v814_v1 = vld [vmem:[#allocation5] sm:$0xff]   ;;  %v815_v2 = vld [vmem:[#allocation5 + $0x8] sm:$0xff]  }
  0x5c   :  { %721 = vmatprep.subr.bf16.mxu0 %v1027_v0  ;;  %737 = vmatprep.mubr.msk.bf16.mxu0 %vm1028_vm0, %v1027_v0  ;;  %v816_v3 = vld [vmem:[#allocation5 + $0x10] sm:$0xff]   ;;  %v822_v4 = vld [vmem:[#allocation7] sm:$0xff]   ;;  %v817_v5 = vld [vmem:[#allocation5 + $0x18] sm:$0xff]  }
  0x5d   :  { %741 = vmatprep.subr.bf16.mxu1 %v1027_v0  ;;  %757 = vmatprep.mubr.msk.bf16.mxu1 %vm1028_vm0, %v1027_v0  ;;  %v823_v6 = vld [vmem:[#allocation7 + $0x8] sm:$0xff]   ;;  %v818_v7 = vld [vmem:[#allocation5 + $0x20] sm:$0xff]   ;;  %v824_v8 = vld [vmem:[#allocation7 + $0x10] sm:$0xff]  }
  0x5e   :  { %722 = vmatpush3.bf16.msra.mxu0 %v814_v1  ;;  %742 = vmatpush3.bf16.msra.mxu1 %v822_v4  ;;  %v819_v9 = vld [vmem:[#allocation5 + $0x28] sm:$0xff]   ;;  %v825_v10 = vld [vmem:[#allocation7 + $0x18] sm:$0xff]   ;;  %v820_v11 = vld [vmem:[#allocation5 + $0x30] sm:$0xff]  }
  0x5f   :  { %723 = vmatprep.subr.bf16.mxu0 %v1027_v0  ;;  %743 = vmatprep.subr.bf16.mxu1 %v1027_v0  ;;  %v826_v12 = vld [vmem:[#allocation7 + $0x20] sm:$0xff]   ;;  %v821_v13 = vld [vmem:[#allocation5 + $0x38] sm:$0xff]   ;;  %v105_v14 = vld [vmem:[#allocation2] sm:$0xff] }
  0x60   :  { %v106_v15 = vld [vmem:[#allocation2 + $0x8] sm:$0xff]  ;;  %v827_v16 = vld [vmem:[#allocation7 + $0x28] sm:$0xff]   ;;  %v828_v18 = vld [vmem:[#allocation7 + $0x30] sm:$0xff]  }
  0x61   :  { %v107_v17 = vpack.c.bf16 %v106_v15, %v105_v14  ;;  %v829_v19 = vld [vmem:[#allocation7 + $0x38] sm:$0xff]   ;;  %v830_v20 = vld [vmem:[#allocation8] sm:$0xff]   ;;  %v831_v21 = vld [vmem:[#allocation8 + $0x8] sm:$0xff]  }
  0x62   :  { %724 = vmatpush3.bf16.msra.mxu0 %v815_v2  ;;  %744 = vmatpush3.bf16.msra.mxu1 %v823_v6  ;;  %v832_v22 = vld [vmem:[#allocation8 + $0x10] sm:$0xff]   ;;  %v833_v23 = vld [vmem:[#allocation8 + $0x18] sm:$0xff]   ;;  %v834_v24 = vld [vmem:[#allocation8 + $0x20] sm:$0xff]  }
  0x63   :  { %725 = vmatprep.subr.bf16.mxu0 %v1027_v0  ;;  %745 = vmatprep.subr.bf16.mxu1 %v1027_v0  ;;  %v835_v25 = vld [vmem:[#allocation8 + $0x28] sm:$0xff]   ;;  %v631_v26 = vld [vmem:[%s1242_s2] ss:$0 sm:$0xff]  ;;  %v837_v37 = vld [vmem:[#allocation8 + $0x38] sm:$0xff]  }
  0x64   :  { %v836_v36 = vld [vmem:[#allocation8 + $0x30] sm:$0xff]   ;;  %v838_v38 = vld [vmem:[#allocation10] sm:$0xff]   ;;  %v839_v39 = vld [vmem:[#allocation10 + $0x8] sm:$0xff]  }
  0x65   :  { %v840_v40 = vld [vmem:[#allocation10 + $0x10] sm:$0xff]   ;;  %v841_v41 = vld [vmem:[#allocation10 + $0x18] sm:$0xff]   ;;  %v842_v42 = vld [vmem:[#allocation10 + $0x20] sm:$0xff]  }
  0x66   :  { %726 = vmatpush3.bf16.msra.mxu0 %v816_v3  ;;  %746 = vmatpush3.bf16.msra.mxu1 %v824_v8  ;;  %v843_v43 = vld [vmem:[#allocation10 + $0x28] sm:$0xff]   ;;  %v640_v44 = vld [vmem:[%s1244_s4] ss:$0 sm:$0xff]  ;;  %v845_v55 = vld [vmem:[#allocation10 + $0x38] sm:$0xff]   ;;  %s1029_s4 = smov [#allocation11]  }
  0x67   :  { %727 = vmatprep.subr.bf16.mxu0 %v1027_v0  ;;  %747 = vmatprep.subr.bf16.mxu1 %v1027_v0  ;;  %v844_v54 = vld [vmem:[#allocation10 + $0x30] sm:$0xff]   ;;  %s601_s19 = sshll.u32 %s1029_s4, 4  ;;  %s602_s19 = int_to_ptr.vmem [resolvable:$true] %s601_s19 }
  0x68   :  { %v649_v56 = vld [vmem:[%s1246_s6] ss:$0 sm:$0xff]  ;;  %s964_s20 = scalar_lea.vmem %s602_s19, 128  ;;  %p969_p13 = scmp.lt.s32.totalorder %s602_s19, %s602_s19 }
  0x69   :  { %p965_p12 = scmp.ne.s32.totalorder %s602_s19, %s964_s20  ;;  %p970_p0 = scmp.lt.s32.totalorder %s964_s20, %s964_s20 }
  0x6a   :  { %728 = vmatpush3.bf16.msra.mxu0 %v817_v5  ;;  %748 = vmatpush3.bf16.msra.mxu1 %v825_v10 }
  0x6b   :  { %729 = vmatprep.subr.bf16.mxu0 %v1027_v0  ;;  %749 = vmatprep.subr.bf16.mxu1 %v1027_v0  ;;  %p971_p1 = por %p970_p0, %p969_p13 }
  0x6d   :  { %p972_p2 = pnand %p971_p1, %p965_p12 }
  0x6e   :  { %730 = vmatpush3.bf16.msra.mxu0 %v818_v7  ;;  %750 = vmatpush3.bf16.msra.mxu1 %v826_v12 }
  0x6f   :  { %731 = vmatprep.subr.bf16.mxu0 %v1027_v0  ;;  %751 = vmatprep.subr.bf16.mxu1 %v1027_v0 }
  0x72   :  { %732 = vmatpush3.bf16.msra.mxu0 %v819_v9  ;;  %752 = vmatpush3.bf16.msra.mxu1 %v827_v16 }
  0x73   :  { %733 = vmatprep.subr.bf16.mxu0 %v1027_v0  ;;  %753 = vmatprep.subr.bf16.mxu1 %v1027_v0 }
  0x76   :  { %734 = vmatpush3.bf16.msra.mxu0 %v820_v11  ;;  %754 = vmatpush3.bf16.msra.mxu1 %v828_v18 }
  0x77   :  { %735 = vmatprep.subr.bf16.mxu0 %v1027_v0  ;;  %755 = vmatprep.subr.bf16.mxu1 %v1027_v0 }
  0x7a   :  { %736 = vmatpush3.bf16.msra.mxu0 %v821_v13  ;;  %756 = vmatpush3.bf16.msra.mxu1 %v829_v19 }
  0x7b   :  { %761 = vmatprep.subr.bf16.mxu0 %v1027_v0  ;;  %781 = vmatprep.subr.bf16.mxu1 %v1027_v0 }
  0x7d   :  { %738 = vmatmul.mubr.bf16.vlgmr.msra.gmra.mrb[0].mxu0 %v107_v17 }
  0x7e   :  { %777 = vmatprep.mubr.msk.bf16.mxu0 %vm1028_vm0, %v1027_v0  ;;  %762 = vmatpush3.bf16.msra.mxu0 %v830_v20 }
  0x7f   :  { %763 = vmatprep.subr.bf16.mxu0 %v1027_v0 }
  0x82   :  { %764 = vmatpush3.bf16.msra.mxu0 %v831_v21 }
  0x83   :  { %765 = vmatprep.subr.bf16.mxu0 %v1027_v0 }
  0x86   :  { %766 = vmatpush3.bf16.msra.mxu0 %v832_v22 }
  0x87   :  { %767 = vmatprep.subr.bf16.mxu0 %v1027_v0 }
  0x8a   :  { %768 = vmatpush3.bf16.msra.mxu0 %v833_v23 }
  0x8b   :  { %769 = vmatprep.subr.bf16.mxu0 %v1027_v0 }
  0x8e   :  { %770 = vmatpush3.bf16.msra.mxu0 %v834_v24 }
  0x8f   :  { %771 = vmatprep.subr.bf16.mxu0 %v1027_v0 }
  0x92   :  { %772 = vmatpush3.bf16.msra.mxu0 %v835_v25 }
  0x93   :  { %773 = vmatprep.subr.bf16.mxu0 %v1027_v0 }
  0x96   :  { %774 = vmatpush3.bf16.msra.mxu0 %v836_v36 }
  0x97   :  { %775 = vmatprep.subr.bf16.mxu0 %v1027_v0 }
  0x9a   :  { %776 = vmatpush3.bf16.msra.mxu0 %v837_v37 }
 0x150   :  { %v213_v27 = vpop.f32.mrb[0].mxu0 }
 0x151   :  { %v214_v28 = vadd.f32 %v631_v26, %v213_v27  ;;  %v739_v29 = vpop.f32.mrb[1].mxu0 }
 0x152   :  { %v216_v30 = vpop.f32.mrb[2].mxu0 }
 0x153   :  { %v217_v31 = vadd.f32 %v631_v26, %v216_v30  ;;  %v740_v32 = vpop.f32.mrb[3].mxu0  ;;  %v220_v33 = vmax.f32 %v214_v28, 0.0 }
 0x155   :  { %v221_v34 = vmax.f32 %v217_v31, 0.0 }
 0x157   :  { %v222_v35 = vpack.c.bf16 %v221_v34, %v220_v33 }
 0x159   :  { %758 = vmatmul.mubr.bf16.vlgmr.msra.gmra.mrb[0].mxu1 %v222_v35 }
 0x15a   :  { %797 = vmatprep.mubr.msk.bf16.mxu1 %vm1028_vm0, %v1027_v0  ;;  %782 = vmatpush3.bf16.msra.mxu1 %v838_v38 }
 0x15b   :  { %783 = vmatprep.subr.bf16.mxu1 %v1027_v0 }
 0x15e   :  { %784 = vmatpush3.bf16.msra.mxu1 %v839_v39 }
 0x15f   :  { %785 = vmatprep.subr.bf16.mxu1 %v1027_v0 }
 0x162   :  { %786 = vmatpush3.bf16.msra.mxu1 %v840_v40 }
 0x163   :  { %787 = vmatprep.subr.bf16.mxu1 %v1027_v0 }
 0x166   :  { %788 = vmatpush3.bf16.msra.mxu1 %v841_v41 }
 0x167   :  { %789 = vmatprep.subr.bf16.mxu1 %v1027_v0 }
 0x16a   :  { %790 = vmatpush3.bf16.msra.mxu1 %v842_v42 }
 0x16b   :  { %791 = vmatprep.subr.bf16.mxu1 %v1027_v0 }
 0x16e   :  { %792 = vmatpush3.bf16.msra.mxu1 %v843_v43 }
 0x16f   :  { %793 = vmatprep.subr.bf16.mxu1 %v1027_v0 }
 0x172   :  { %794 = vmatpush3.bf16.msra.mxu1 %v844_v54 }
 0x173   :  { %795 = vmatprep.subr.bf16.mxu1 %v1027_v0 }
 0x176   :  { %796 = vmatpush3.bf16.msra.mxu1 %v845_v55 }
 0x22c   :  { %v328_v45 = vpop.f32.mrb[0].mxu1 }
 0x22d   :  { %v329_v46 = vadd.f32 %v640_v44, %v328_v45  ;;  %v759_v47 = vpop.f32.mrb[1].mxu1 }
 0x22e   :  { %v331_v48 = vpop.f32.mrb[2].mxu1 }
 0x22f   :  { %v332_v49 = vadd.f32 %v640_v44, %v331_v48  ;;  %v760_v50 = vpop.f32.mrb[3].mxu1  ;;  %v335_v51 = vmax.f32 %v329_v46, 0.0 }
 0x231   :  { %v336_v52 = vmax.f32 %v332_v49, 0.0 }
 0x233   :  { %v337_v53 = vpack.c.bf16 %v336_v52, %v335_v51 }
 0x235   :  { %679 = vst [vmem:[#allocation11] sm:$0xff] %v337_v53   ;;  %778 = vmatmul.mubr.bf16.vlgmr.msra.gmra.mrb[4].mxu0 %v337_v53 }
 0x308   :  { %v443_v57 = vpop.f32.mrb[4].mxu0 }
 0x309   :  { %v444_v58 = vadd.f32 %v649_v56, %v443_v57  ;;  %v779_v59 = vpop.f32.mrb[5].mxu0 }
 0x30a   :  { %v446_v60 = vpop.f32.mrb[6].mxu0 }
 0x30b   :  { %v447_v61 = vadd.f32 %v649_v56, %v446_v60  ;;  %v780_v62 = vpop.f32.mrb[7].mxu0  ;;  %v450_v63 = vmax.f32 %v444_v58, 0.0 }
 0x30d   :  { %v451_v1 = vmax.f32 %v447_v61, 0.0 }
 0x30f   :  { %v452_v2 = vpack.c.bf16 %v451_v1, %v450_v63 }
 0x311   :  { %798 = vmatmul.mubr.bf16.vlgmr.msra.gmra.mrb[4].mxu1 %v452_v2 }
 0x312   :  { %975 = shalt.err (!%p972_p2)
}
 0x313   :  { %s976_s22 = scalar_lea.hbm %s1249_s9, 128 }
 0x314   :  { %p977_p3 = scmp.ne.s32.totalorder %s1249_s9, %s976_s22  ;;  %p980_p4 = scmp.lt.u32.totalorder %s976_s22, %s1249_s9 }
 0x316   :  { %p982_p5 = pnand %p980_p4, %p977_p3 }
 0x318   :  { %985 = shalt.err (!%p982_p5)
}
 0x319   :  { %607 = dma.vmem_to_hbm [thread:$0]  %s602_s19, 128, %s1249_s9, [#allocation4], %s1019_s23, %s1019_s23, %s1020_s24  }
 0x31a   :  { %v658_v0 = vld [vmem:[%s1248_s8] ss:$0 sm:$0xff]  ;;  %s1030_s9 = smov [#allocation12]  }
 0x31b   :  { %s613_s8 = sshll.u32 %s1030_s9, 4  ;;  %s614_s8 = int_to_ptr.vmem [resolvable:$true] %s613_s8 }
 0x31c   :  { %s986_s28 = scalar_lea.vmem %s614_s8, 128  ;;  %p991_p7 = scmp.lt.s32.totalorder %s614_s8, %s614_s8 }
 0x31d   :  { %p987_p6 = scmp.ne.s32.totalorder %s614_s8, %s986_s28  ;;  %p992_p8 = scmp.lt.s32.totalorder %s986_s28, %s986_s28 }
 0x31f   :  { %p993_p9 = por %p992_p8, %p991_p7 }
 0x321   :  { %p994_p10 = pnand %p993_p9, %p987_p6 }
 0x3e4   :  { %v558_v3 = vpop.f32.mrb[4].mxu1 }
 0x3e5   :  { %v559_v4 = vadd.f32 %v658_v0, %v558_v3  ;;  %v799_v5 = vpop.f32.mrb[5].mxu1 }
 0x3e6   :  { %v561_v6 = vpop.f32.mrb[6].mxu1 }
 0x3e7   :  { %v565_v7 = vsub.f32 0.0, %v559_v4  ;;  %v562_v8 = vadd.f32 %v658_v0, %v561_v6  ;;  %v800_v9 = vpop.f32.mrb[7].mxu1 }
 0x3e9   :  { %v567_v10 = vmul.f32 1.442695, %v565_v7  ;;  %v566_v11 = vsub.f32 0.0, %v562_v8 }
 0x3eb   :  { %846 = vpow2.f32 %v567_v10  ;;  %v569_v12 = vmul.f32 1.442695, %v566_v11 }
 0x3ed   :  { %848 = vpow2.f32 %v569_v12 }
 0x3f5   :  { %v847_v13 = vpop.eup %846 }
 0x3f6   :  { %v571_v14 = vadd.f32 1.0, %v847_v13 }
 0x3f7   :  { %v849_v15 = vpop.eup %848 }
 0x3f8   :  { %v572_v16 = vadd.f32 1.0, %v849_v15  ;;  %850 = vrcp.f32 %v571_v14 }
 0x3fa   :  { %852 = vrcp.f32 %v572_v16 }
 0x402   :  { %v851_v17 = vpop.eup %850 }
 0x404   :  { %v853_v18 = vpop.eup %852 }
 0x405   :  { %v683_v19 = vpack.c.bf16 %v853_v18, %v851_v17 }
 0x407   :  { %684 = vst [vmem:[#allocation12] sm:$0xff] %v683_v19  }
 0x408   :  { %997 = shalt.err (!%p994_p10)
}
 0x409   :  { %s998_s15 = scalar_lea.hbm %s1250_s10, 128 }
 0x40a   :  { %p999_p11 = scmp.ne.s32.totalorder %s1250_s10, %s998_s15  ;;  %p1002_p12 = scmp.lt.u32.totalorder %s998_s15, %s1250_s10 }
 0x40c   :  { %p1004_p13 = pnand %p1002_p12, %p999_p11 }
 0x40e   :  { %1007 = shalt.err (!%p1004_p13)
}
 0x40f   :  { %619 = dma.vmem_to_hbm [thread:$0]  %s614_s8, 128, %s1250_s10, [#allocation13], %s1019_s23, %s1019_s23, %s1020_s24  }
 0x410   :  { %1014 = dma.done.wait [#allocation4], 128  }
 0x411   :  { %1015 = vsyncadd [#allocation4], 4294967168 }
 0x412   :  { %1016 = dma.done.wait [#allocation13], 128  }
 0x413   :  { %1017 = vsyncadd [#allocation13], 4294967168 }
 0x414   :  { %626 = vsyncpa [#allocation3], 1 }
 0x415   :  { %627 = vsyncpa [#allocation6], 1 }
 0x416   :  { %628 = vsyncpa [#allocation9], 1 }
 0x417   :  { %629 = vsyncpa [#allocation4], 1 }
 0x418   :  { %630 = vsyncpa [#allocation13], 1 }

</bundles_post_ra>
